<compile_context>
chip_gen: v7x
topology: tpu7x:2x2x1
jax: 0.10.0
libtpu: 0.0.40
codegen_flags: <defaults>
</compile_context>

<pallas_src>
import jax
import jax.numpy as jnp
from jax.experimental import pallas as pl
from jax.experimental.pallas import tpu as pltpu  # noqa: F401  (TPU backend)

IN_DIM = 300
HID_DIM = 50
OUT_DIM = 10


def _two_branch_mlp_kernel(x1_ref, x2_ref,
                           w1a_ref, b1a_ref, w1b_ref, b1b_ref,
                           w2a_ref, b2a_ref, w2b_ref, b2b_ref,
                           out_ref):
    x1 = x1_ref[...]                              # (B, 300) float32
    x2 = x2_ref[...].astype(jnp.float32)          # (B, 300) int32 -> float32

    def branch(x, wa, ba, wb, bb):
        h = jnp.dot(x, wa, preferred_element_type=jnp.float32) + ba   # (B, 50)
        h = jnp.maximum(h, 0.0)                                       # ReLU (VPU)
        return jnp.dot(h, wb, preferred_element_type=jnp.float32) + bb  # (B, 10)

    y1 = branch(x1, w1a_ref[...], b1a_ref[...], w1b_ref[...], b1b_ref[...])
    y2 = branch(x2, w2a_ref[...], b2a_ref[...], w2b_ref[...], b2b_ref[...])

    # torch.cat((x1, x2), 0) -> (2B, 10)
    y = jnp.concatenate([y1, y2], axis=0)

    # F.log_softmax(y, dim=1), numerically stable.
    m = jnp.max(y, axis=1, keepdims=True)
    z = y - m
    lse = jnp.log(jnp.sum(jnp.exp(z), axis=1, keepdims=True))
    out_ref[...] = (z - lse).astype(out_ref.dtype)


def multiple_input_forward(x1, x2, params):
    """JAX wrapper: layout glue (transpose weights, 2-D biases) + pallas_call."""
    b = x1.shape[0]

    inputs = (
        x1, x2,
        params["fc1a_w"].T, params["fc1a_b"].reshape(1, HID_DIM),
        params["fc1b_w"].T, params["fc1b_b"].reshape(1, OUT_DIM),
        params["fc2a_w"].T, params["fc2a_b"].reshape(1, HID_DIM),
        params["fc2b_w"].T, params["fc2b_b"].reshape(1, OUT_DIM),
    )

    def full_spec(a):
        nd = a.ndim
        return pl.BlockSpec(a.shape, lambda: (0,) * nd)

    return pl.pallas_call(
        _two_branch_mlp_kernel,
        out_shape=jax.ShapeDtypeStruct((2 * b, OUT_DIM), jnp.float32),
        in_specs=[full_spec(a) for a in inputs],
        out_specs=pl.BlockSpec((2 * b, OUT_DIM), lambda: (0, 0)),
    )(*inputs)


def init_params(key):
    """PyTorch nn.Linear-style init: U(-1/sqrt(fan_in), 1/sqrt(fan_in))."""
    ks = jax.random.split(key, 8)

    def lin(kw, kb, out_f, in_f):
        bound = 1.0 / jnp.sqrt(jnp.float32(in_f))
        w = jax.random.uniform(kw, (out_f, in_f), jnp.float32, -bound, bound)
        bb = jax.random.uniform(kb, (out_f,), jnp.float32, -bound, bound)
        return w, bb

    w1a, b1a = lin(ks[0], ks[1], HID_DIM, IN_DIM)
    w1b, b1b = lin(ks[2], ks[3], OUT_DIM, HID_DIM)
    w2a, b2a = lin(ks[4], ks[5], HID_DIM, IN_DIM)
    w2b, b2b = lin(ks[6], ks[7], OUT_DIM, HID_DIM)
    return {
        "fc1a_w": w1a, "fc1a_b": b1a,
        "fc1b_w": w1b, "fc1b_b": b1b,
        "fc2a_w": w2a, "fc2a_b": b2a,
        "fc2b_w": w2b, "fc2b_b": b2b,
    }


if __name__ == "__main__":
    key = jax.random.PRNGKey(0)
    k_param, k_x1, k_x2 = jax.random.split(key, 3)

    batch = 2
    x1 = jax.random.normal(k_x1, (batch, IN_DIM), jnp.float32)
    # "Different dtype" input: integer tensor (torch.long analogue), cast to
    # float inside the kernel exactly like x2.type(torch.float).
    x2 = jax.random.randint(k_x2, (batch, IN_DIM), -3, 4, jnp.int32)

    params = init_params(k_param)

    out = multiple_input_forward(x1, x2, params)
    out = jax.block_until_ready(out)

    # Pure-JAX reference of the same forward pass.
    def ref(x1, x2, p):
        h1 = jnp.maximum(x1 @ p["fc1a_w"].T + p["fc1a_b"], 0.0)
        y1 = h1 @ p["fc1b_w"].T + p["fc1b_b"]
        x2f = x2.astype(jnp.float32)
        h2 = jnp.maximum(x2f @ p["fc2a_w"].T + p["fc2a_b"], 0.0)
        y2 = h2 @ p["fc2b_w"].T + p["fc2b_b"]
        y = jnp.concatenate([y1, y2], axis=0)
        return jax.nn.log_softmax(y, axis=1)

    expected = ref(x1, x2, params)
    assert out.shape == (2 * batch, OUT_DIM)
    assert bool(jnp.allclose(out, expected, atol=2e-3, rtol=2e-3)), (
        f"max abs diff = {jnp.max(jnp.abs(out - expected))}")

    print("KERNEL_OK")
</pallas_src>

<mosaic_0001>
module attributes {stable_mosaic.version = 11 : i64} {
  func.func @_two_branch_mlp_kernel(%arg0: memref<2x300xf32, #tpu.memory_space<vmem>>, %arg1: memref<2x300xi32, #tpu.memory_space<vmem>>, %arg2: memref<300x50xf32, #tpu.memory_space<vmem>>, %arg3: memref<1x50xf32, #tpu.memory_space<vmem>>, %arg4: memref<50x10xf32, #tpu.memory_space<vmem>>, %arg5: memref<1x10xf32, #tpu.memory_space<vmem>>, %arg6: memref<300x50xf32, #tpu.memory_space<vmem>>, %arg7: memref<1x50xf32, #tpu.memory_space<vmem>>, %arg8: memref<50x10xf32, #tpu.memory_space<vmem>>, %arg9: memref<1x10xf32, #tpu.memory_space<vmem>>, %arg10: memref<4x10xf32, #tpu.memory_space<vmem>>) attributes {dimension_semantics = [], scalar_prefetch = 0 : i64, scratch_operands = 0 : i64, tpu.core_type = #tpu.core_type<tc>} {
    %c0 = arith.constant 0 : index
    %c0_0 = arith.constant 0 : index
    %0 = vector.load %arg0[%c0, %c0_0] : memref<2x300xf32, #tpu.memory_space<vmem>>, vector<2x300xf32>
    %c0_1 = arith.constant 0 : index
    %c0_2 = arith.constant 0 : index
    %1 = vector.load %arg1[%c0_1, %c0_2] : memref<2x300xi32, #tpu.memory_space<vmem>>, vector<2x300xi32>
    %2 = arith.sitofp %1 : vector<2x300xi32> to vector<2x300xf32>
    %c0_3 = arith.constant 0 : index
    %c0_4 = arith.constant 0 : index
    %3 = vector.load %arg2[%c0_3, %c0_4] : memref<300x50xf32, #tpu.memory_space<vmem>>, vector<300x50xf32>
    %c0_5 = arith.constant 0 : index
    %c0_6 = arith.constant 0 : index
    %4 = vector.load %arg3[%c0_5, %c0_6] : memref<1x50xf32, #tpu.memory_space<vmem>>, vector<1x50xf32>
    %c0_7 = arith.constant 0 : index
    %c0_8 = arith.constant 0 : index
    %5 = vector.load %arg4[%c0_7, %c0_8] : memref<50x10xf32, #tpu.memory_space<vmem>>, vector<50x10xf32>
    %c0_9 = arith.constant 0 : index
    %c0_10 = arith.constant 0 : index
    %6 = vector.load %arg5[%c0_9, %c0_10] : memref<1x10xf32, #tpu.memory_space<vmem>>, vector<1x10xf32>
    %cst = arith.constant dense<0.000000e+00> : vector<2x50xf32>
    %7 = tpu.matmul %0, %3, %cst {dimension_numbers = #tpu.dot_dimension_numbers<[1], [0], [0], [1], [0, 0, 1, 1], [], []>} : vector<2x300xf32>, vector<300x50xf32>, vector<2x50xf32> -> vector<2x50xf32>
    %8 = vector.broadcast %4 : vector<1x50xf32> to vector<2x50xf32>
    %9 = arith.addf %7, %8 : vector<2x50xf32>
    %cst_11 = arith.constant 0.000000e+00 : f32
    %10 = vector.broadcast %cst_11 : f32 to vector<2x50xf32>
    %11 = arith.maximumf %9, %10 : vector<2x50xf32>
    %cst_12 = arith.constant dense<0.000000e+00> : vector<2x10xf32>
    %12 = tpu.matmul %11, %5, %cst_12 {dimension_numbers = #tpu.dot_dimension_numbers<[1], [0], [0], [1], [0, 0, 1, 1], [], []>} : vector<2x50xf32>, vector<50x10xf32>, vector<2x10xf32> -> vector<2x10xf32>
    %13 = vector.broadcast %6 : vector<1x10xf32> to vector<2x10xf32>
    %14 = arith.addf %12, %13 : vector<2x10xf32>
    %c0_13 = arith.constant 0 : index
    %c0_14 = arith.constant 0 : index
    %15 = vector.load %arg6[%c0_13, %c0_14] : memref<300x50xf32, #tpu.memory_space<vmem>>, vector<300x50xf32>
    %c0_15 = arith.constant 0 : index
    %c0_16 = arith.constant 0 : index
    %16 = vector.load %arg7[%c0_15, %c0_16] : memref<1x50xf32, #tpu.memory_space<vmem>>, vector<1x50xf32>
    %c0_17 = arith.constant 0 : index
    %c0_18 = arith.constant 0 : index
    %17 = vector.load %arg8[%c0_17, %c0_18] : memref<50x10xf32, #tpu.memory_space<vmem>>, vector<50x10xf32>
    %c0_19 = arith.constant 0 : index
    %c0_20 = arith.constant 0 : index
    %18 = vector.load %arg9[%c0_19, %c0_20] : memref<1x10xf32, #tpu.memory_space<vmem>>, vector<1x10xf32>
    %cst_21 = arith.constant dense<0.000000e+00> : vector<2x50xf32>
    %19 = tpu.matmul %2, %15, %cst_21 {dimension_numbers = #tpu.dot_dimension_numbers<[1], [0], [0], [1], [0, 0, 1, 1], [], []>} : vector<2x300xf32>, vector<300x50xf32>, vector<2x50xf32> -> vector<2x50xf32>
    %20 = vector.broadcast %16 : vector<1x50xf32> to vector<2x50xf32>
    %21 = arith.addf %19, %20 : vector<2x50xf32>
    %cst_22 = arith.constant 0.000000e+00 : f32
    %22 = vector.broadcast %cst_22 : f32 to vector<2x50xf32>
    %23 = arith.maximumf %21, %22 : vector<2x50xf32>
    %cst_23 = arith.constant dense<0.000000e+00> : vector<2x10xf32>
    %24 = tpu.matmul %23, %17, %cst_23 {dimension_numbers = #tpu.dot_dimension_numbers<[1], [0], [0], [1], [0, 0, 1, 1], [], []>} : vector<2x50xf32>, vector<50x10xf32>, vector<2x10xf32> -> vector<2x10xf32>
    %25 = vector.broadcast %18 : vector<1x10xf32> to vector<2x10xf32>
    %26 = arith.addf %24, %25 : vector<2x10xf32>
    %27 = tpu.concatenate %14, %26 in 0 : vector<2x10xf32>, vector<2x10xf32> -> vector<4x10xf32>
    %cst_24 = arith.constant dense<0xFF800000> : vector<4xf32>
    %28 = vector.multi_reduction <maximumf>, %27, %cst_24 [1] : vector<4x10xf32> to vector<4xf32>
    %29 = vector.shape_cast %28 : vector<4xf32> to vector<4x1xf32>
    %30 = vector.broadcast %29 : vector<4x1xf32> to vector<4x10xf32>
    %31 = arith.subf %27, %30 : vector<4x10xf32>
    %32 = math.exp %31 : vector<4x10xf32>
    %cst_25 = arith.constant dense<0.000000e+00> : vector<4xf32>
    %33 = vector.multi_reduction <add>, %32, %cst_25 [1] : vector<4x10xf32> to vector<4xf32>
    %34 = vector.shape_cast %33 : vector<4xf32> to vector<4x1xf32>
    %35 = math.log %34 : vector<4x1xf32>
    %36 = vector.broadcast %35 : vector<4x1xf32> to vector<4x10xf32>
    %37 = arith.subf %31, %36 : vector<4x10xf32>
    %c0_26 = arith.constant 0 : index
    %c0_27 = arith.constant 0 : index
    %38 = vector.load %arg10[%c0_26, %c0_27] : memref<4x10xf32, #tpu.memory_space<vmem>>, vector<4x10xf32>
    tpu.vector_store %arg10[%c0_26, %c0_27], %37 {strides = array<i32>} : memref<4x10xf32, #tpu.memory_space<vmem>>, vector<4x10xf32>,
    return
  }
}

</mosaic_0001>

<bundles_post_ra>
// kernel: tpu_custom_call.1
= control target key start
LH: loop header
LB: loop body
LE: loop exit
PB: predicated region body
PF: predicated region fallthrough
CT: control target
= control target key end

     0   :  { %v988_v7 = vmov 0.0|0.0   ;;  %v989_v8 = vmov 1983009808   ;;  %v97_v10 = vlaneseq  ;;  %vm990_vm0 = vmmov 0   ;;  %s1400_s0 = inlined_call_operand.vmem [shape: f32[2,300], index: 0, kind: input, shape index: {}]   ;;  %s1401_s1 = inlined_call_operand.vmem [shape: s32[2,300], index: 1, kind: input, shape index: {}]   ;;  %s1402_s2 = inlined_call_operand.vmem [shape: f32[300,50], index: 2, kind: input, shape index: {}]   ;;  %s1403_s3 = inlined_call_operand.vmem [shape: f32[1,50], index: 3, kind: input, shape index: {}]   ;;  %s1404_s4 = inlined_call_operand.vmem [shape: f32[50,10], index: 4, kind: input, shape index: {}]   ;;  %s1405_s5 = inlined_call_operand.vmem [shape: f32[1,10], index: 5, kind: input, shape index: {}]   ;;  %s1406_s6 = inlined_call_operand.vmem [shape: f32[300,50], index: 6, kind: input, shape index: {}]   ;;  %s1407_s7 = inlined_call_operand.vmem [shape: f32[1,50], index: 7, kind: input, shape index: {}]   ;;  %s1408_s8 = inlined_call_operand.vmem [shape: f32[50,10], index: 8, kind: input, shape index: {}]   ;;  %s1409_s9 = inlined_call_operand.vmem [shape: f32[1,10], index: 9, kind: input, shape index: {}]   ;;  %s1410_s10 = inlined_call_operand.hbm [shape: f32[4,10], index: 10, kind: output, shape index: {}]  }
   0x1   :  { %v55_v0 = vld [vmem:[%s1402_s2 + $0x80] sm:$0xff]  ;;  %v56_v1 = vld [vmem:[%s1402_s2 + $0x88] sm:$0xff]  ;;  %v57_v5 = vld [vmem:[%s1402_s2 + $0x90] sm:$0xff]  ;;  %883 = vmatprep.subr.bf16.mxu1 %v988_v7  ;;  %v95_v9 = vunpack.c.l.s4 %v989_v8  ;;  %v991_v18 = vmov 0.0   ;;  %vm114_vm1 = vcmask 1043456  }
   0x2   :  { %v39_v2 = vld [vmem:[%s1402_s2] sm:$0xff]  ;;  %v851_v3 = vpack.c.bf16 %v56_v1, %v55_v0  ;;  %v40_v4 = vld [vmem:[%s1402_s2 + $0x8] sm:$0xff]  ;;  %v58_v6 = vld [vmem:[%s1402_s2 + $0x98] sm:$0xff]  ;;  %799 = vmatprep.mubr.msk.f32.mxu1 %vm990_vm0, %v991_v18  ;;  %v98_v23 = vshrl.u32 %v97_v10, 7 }
   0x3   :  { %v853_v11 = vpack.c.bf16 %v40_v4, %v39_v2  ;;  %v855_v12 = vpack.c.bf16 %v58_v6, %v57_v5  ;;  %v41_v13 = vld [vmem:[%s1402_s2 + $0x10] sm:$0xff]  ;;  %v42_v14 = vld [vmem:[%s1402_s2 + $0x18] sm:$0xff]  ;;  %v59_v15 = vld [vmem:[%s1402_s2 + $0xa0] sm:$0xff]  ;;  %v96_v22 = vunpack.c.0.s8 %v95_v9 }
   0x4   :  { %852 = vmatprep.subr.bf16.mxu0 %v851_v3  ;;  %v60_v16 = vld [vmem:[%s1402_s2 + $0xa8] sm:$0xff]  ;;  %v857_v17 = vpack.c.bf16 %v42_v14, %v41_v13  ;;  %v43_v20 = vld [vmem:[%s1402_s2 + $0x20] sm:$0xff]  ;;  %v61_v24 = vld [vmem:[%s1402_s2 + $0xb0] sm:$0xff] }
   0x5   :  { %854 = vmatpush3.bf16.msra.mxu0 %v853_v11  ;;  %v859_v19 = vpack.c.bf16 %v60_v16, %v59_v15  ;;  %v44_v21 = vld [vmem:[%s1402_s2 + $0x28] sm:$0xff]  ;;  %v62_v25 = vld [vmem:[%s1402_s2 + $0xb8] sm:$0xff]  ;;  %v45_v27 = vld [vmem:[%s1402_s2 + $0x30] sm:$0xff]  ;;  %v1106_v32 = vsub.s32 %v96_v22, %v98_v23 }
   0x6   :  { %856 = vmatprep.subr.bf16.mxu0 %v855_v12  ;;  %v861_v26 = vpack.c.bf16 %v44_v21, %v43_v20  ;;  %v863_v28 = vpack.c.bf16 %v62_v25, %v61_v24  ;;  %v46_v29 = vld [vmem:[%s1402_s2 + $0x38] sm:$0xff]  ;;  %v71_v30 = vld [vmem:[%s1402_s2 + $0x100] sm:$0xff]  ;;  %v72_v31 = vld [vmem:[%s1402_s2 + $0x108] sm:$0xff] }
   0x7   :  { %v63_v33 = vld [vmem:[%s1402_s2 + $0xc0] sm:$0xff]  ;;  %v64_v34 = vld [vmem:[%s1402_s2 + $0xc8] sm:$0xff]  ;;  %v884_v35 = vpack.c.bf16 %v72_v31, %v71_v30  ;;  %v73_v36 = vld [vmem:[%s1402_s2 + $0x110] sm:$0xff]  ;;  %v865_v38 = vpack.c.bf16 %v46_v29, %v45_v27 }
   0x8   :  { %v74_v37 = vld [vmem:[%s1402_s2 + $0x118] sm:$0xff]  ;;  %v47_v39 = vld [vmem:[%s1402_s2 + $0x40] sm:$0xff]  ;;  %v867_v42 = vpack.c.bf16 %v64_v34, %v63_v33  ;;  %v48_v43 = vld [vmem:[%s1402_s2 + $0x48] sm:$0xff] }
   0x9   :  { %858 = vmatpush3.bf16.msra.mxu0 %v857_v17  ;;  %885 = vmatpush3.bf16.msra.mxu1 %v884_v35  ;;  %v887_v40 = vpack.c.bf16 %v74_v37, %v73_v36  ;;  %v36_v41 = vld [vmem:[%s1400_s0] sm:$0x3f]  ;;  %v76_v46 = vld [vmem:[%s1402_s2 + $0x128] sm:$0xf]  ;;  %v65_v47 = vld [vmem:[%s1402_s2 + $0xd0] sm:$0xff] }
   0xa   :  { %860 = vmatprep.subr.bf16.mxu0 %v859_v19  ;;  %886 = vmatprep.subr.bf16.mxu1 %v988_v7  ;;  %v100_v44 = vrot.slane %v36_v41, %v1106_v32  ;;  %v75_v45 = vld [vmem:[%s1402_s2 + $0x120] sm:$0xff]  ;;  %v66_v48 = vld [vmem:[%s1402_s2 + $0xd8] sm:$0xff] }
   0xd   :  { %862 = vmatpush3.bf16.msra.mxu0 %v861_v26 }
   0xe   :  { %864 = vmatprep.subr.bf16.mxu0 %v863_v28 }
   0xf   :  { %15 = vsyncpa [#allocation3], 0  ;;  %v93_v49 = vcombine.high %v36_v41, %v36_v41  ;;  %v108_v50 = vcombine.high %v100_v44, %v100_v44  ;;  %v869_v51 = vpack.c.bf16 %v48_v43, %v47_v39  ;;  %v49_v52 = vld [vmem:[%s1402_s2 + $0x50] sm:$0xff]  ;;  %v50_v53 = vld [vmem:[%s1402_s2 + $0x58] sm:$0xff]  ;;  %888 = vmatpush3.bf16.msra.mxu1 %v887_v40  ;;  %v890_v54 = vpack.c.bf16 %v76_v46, %v75_v45 }
  0x10   :  { %v871_v55 = vpack.c.bf16 %v66_v48, %v65_v47  ;;  %vm992_vm2 = vmmov 1   ;;  %v78_v57 = vld [vmem:[%s1404_s4] sm:$0xff]  ;;  %v79_v58 = vld [vmem:[%s1404_s4 + $0x8] sm:$0xff]  ;;  %889 = vmatprep.subr.bf16.mxu1 %v988_v7  ;;  %v873_v62 = vpack.c.bf16 %v50_v53, %v49_v52  ;;  %vm111_vm4 = vcmask 359424   ;;  %v69_v3 = vld [vmem:[%s1402_s2 + $0xf0] sm:$0xff] }
  0x11   :  { %866 = vmatpush3.bf16.msra.mxu0 %v865_v38  ;;  %182 = vmatprep.mubr.f32.mxu0 %v108_v50  ;;  %vm1149_vm3 = vmpackc.low %vm114_vm1, %vm992_vm2  ;;  %v67_v59 = vld [vmem:[%s1402_s2 + $0xe0] sm:$0xff]  ;;  %v68_v60 = vld [vmem:[%s1402_s2 + $0xe8] sm:$0xff]  ;;  %v107_v61 = vrot.slane %v93_v49, %v1106_v32  ;;  %v894_v63 = vpack.c.bf16 %v79_v58, %v78_v57  ;;  %vm269_vm5 = vcmask 1041408   ;;  %vm265_vm6 = vcmask 408576  }
  0x12   :  { %868 = vmatprep.subr.bf16.mxu0 %v867_v42  ;;  %v875_v0 = vpack.c.bf16 %v68_v60, %v67_v59  ;;  %v51_v1 = vld [vmem:[%s1402_s2 + $0x60] sm:$0xff]  ;;  %v52_v2 = vld [vmem:[%s1402_s2 + $0x68] sm:$0xff]  ;;  %v70_v4 = vld [vmem:[%s1402_s2 + $0xf8] sm:$0xff]  ;;  %vm647_vm7 = vcmask 76800  }
  0x13   :  { %892 = vmatpush3.bf16.msk.msra.mxu1 %vm1149_vm3, %v890_v54  ;;  %v877_v5 = vpack.c.bf16 %v52_v2, %v51_v1  ;;  %v879_v6 = vpack.c.bf16 %v70_v4, %v69_v3  ;;  %v53_v8 = vld [vmem:[%s1402_s2 + $0x70] sm:$0xff]  ;;  %v54_v9 = vld [vmem:[%s1402_s2 + $0x78] sm:$0xff]  ;;  %v82_v14 = vld [vmem:[%s1404_s4 + $0x20] sm:$0xff] }
  0x14   :  { %893 = vmatprep.subr.bf16.mxu1 %v988_v7  ;;  %v881_v10 = vpack.c.bf16 %v54_v9, %v53_v8  ;;  %v80_v11 = vld [vmem:[%s1404_s4 + $0x10] sm:$0xff]  ;;  %v81_v12 = vld [vmem:[%s1404_s4 + $0x18] sm:$0xff]  ;;  %v83_v15 = vld [vmem:[%s1404_s4 + $0x28] sm:$0xff] }
  0x15   :  { %870 = vmatpush3.bf16.msra.mxu0 %v869_v51  ;;  %v897_v13 = vpack.c.bf16 %v81_v12, %v80_v11  ;;  %v900_v16 = vpack.c.bf16 %v83_v15, %v82_v14  ;;  %v359_v17 = vld [vmem:[%s1406_s6 + $0x80] sm:$0xff]  ;;  %v360_v19 = vld [vmem:[%s1406_s6 + $0x88] sm:$0xff]  ;;  %v84_v20 = vld [vmem:[%s1404_s4 + $0x30] sm:$0x3] }
  0x16   :  { %872 = vmatprep.subr.bf16.mxu0 %v871_v55  ;;  %800 = vmatmul.mubr.msk.f32.vlgmr.msra.gmra.mrb[0].mxu1 %vm111_vm4, %v107_v61  ;;  %v902_v21 = vpack.c.bf16 %v360_v19, %v359_v17  ;;  %v375_v22 = vld [vmem:[%s1406_s6 + $0x100] sm:$0xff]  ;;  %v376_v23 = vld [vmem:[%s1406_s6 + $0x108] sm:$0xff]  ;;  %v377_v26 = vld [vmem:[%s1406_s6 + $0x110] sm:$0xff] }
  0x17   :  { %895 = vmatpush3.bf16.msra.mxu1 %v894_v63  ;;  %816 = vmatprep.mubr.msk.f32.mxu1 %vm990_vm0, %v991_v18  ;;  %v935_v24 = vpack.c.bf16 %v376_v23, %v375_v22  ;;  %v37_v25 = vld [vmem:[%s1401_s1] sm:$0x3f]  ;;  %v378_v27 = vld [vmem:[%s1406_s6 + $0x118] sm:$0xff]  ;;  %v380_v33 = vld [vmem:[%s1406_s6 + $0x128] sm:$0xf] }
  0x18   :  { %896 = vmatprep.subr.bf16.mxu1 %v988_v7  ;;  %v38_v28 = vcvt.s32.f32 %v37_v25  ;;  %v938_v29 = vpack.c.bf16 %v378_v27, %v377_v26  ;;  %v379_v31 = vld [vmem:[%s1406_s6 + $0x120] sm:$0xff]  ;;  %v344_v45 = vld [vmem:[%s1406_s6 + $0x8] sm:$0xff]  ;;  %v361_v46 = vld [vmem:[%s1406_s6 + $0x90] sm:$0xff] }
  0x19   :  { %874 = vmatpush3.bf16.msra.mxu0 %v873_v62  ;;  %v941_v34 = vpack.c.bf16 %v380_v33, %v379_v31  ;;  %v675_v40 = vld [vmem:[%s1403_s3] ss:$0 sm:$0xff]  ;;  %v362_v47 = vld [vmem:[%s1406_s6 + $0x98] sm:$0xff]  ;;  %v345_v52 = vld [vmem:[%s1406_s6 + $0x10] sm:$0xff] }
  0x1a   :  { %876 = vmatprep.subr.bf16.mxu0 %v875_v0  ;;  %v397_v30 = vcombine.high %v38_v28, %v38_v28  ;;  %v1253_v42 = vrot.slane %v38_v28, %v1106_v32  ;;  %v906_v51 = vpack.c.bf16 %v362_v47, %v361_v46  ;;  %v346_v53 = vld [vmem:[%s1406_s6 + $0x18] sm:$0xff]  ;;  %v363_v54 = vld [vmem:[%s1406_s6 + $0xa0] sm:$0xff]  ;;  %v364_v55 = vld [vmem:[%s1406_s6 + $0xa8] sm:$0xff] }
  0x1b   :  { %898 = vmatpush3.bf16.msra.mxu1 %v897_v13  ;;  %v908_v56 = vpack.c.bf16 %v346_v53, %v345_v52  ;;  %v910_v57 = vpack.c.bf16 %v364_v55, %v363_v54  ;;  %v347_v58 = vld [vmem:[%s1406_s6 + $0x20] sm:$0xff]  ;;  %v348_v59 = vld [vmem:[%s1406_s6 + $0x28] sm:$0xff]  ;;  %v365_v60 = vld [vmem:[%s1406_s6 + $0xb0] sm:$0xff] }
  0x1c   :  { %899 = vmatprep.subr.bf16.mxu1 %v988_v7  ;;  %v411_v35 = vrot.slane %v397_v30, %v1106_v32  ;;  %v412_v49 = vcombine.high %v1253_v42, %v1253_v42  ;;  %v366_v61 = vld [vmem:[%s1406_s6 + $0xb8] sm:$0xff]  ;;  %v912_v62 = vpack.c.bf16 %v348_v59, %v347_v58  ;;  %v349_v0 = vld [vmem:[%s1406_s6 + $0x30] sm:$0xff]  ;;  %v367_v2 = vld [vmem:[%s1406_s6 + $0xc0] sm:$0xff] }
  0x1d   :  { %878 = vmatpush3.bf16.msra.mxu0 %v877_v5  ;;  %v914_v63 = vpack.c.bf16 %v366_v61, %v365_v60  ;;  %v350_v1 = vld [vmem:[%s1406_s6 + $0x38] sm:$0xff]  ;;  %v368_v3 = vld [vmem:[%s1406_s6 + $0xc8] sm:$0xff]  ;;  %v369_v9 = vld [vmem:[%s1406_s6 + $0xd0] sm:$0xff] }
  0x1e   :  { %880 = vmatprep.subr.bf16.mxu0 %v879_v6  ;;  %v916_v4 = vpack.c.bf16 %v350_v1, %v349_v0  ;;  %v918_v5 = vpack.c.bf16 %v368_v3, %v367_v2  ;;  %v351_v6 = vld [vmem:[%s1406_s6 + $0x40] sm:$0xff]  ;;  %v352_v8 = vld [vmem:[%s1406_s6 + $0x48] sm:$0xff]  ;;  %v353_v13 = vld [vmem:[%s1406_s6 + $0x50] sm:$0xff] }
  0x1f   :  { %901 = vmatpush3.bf16.msra.mxu1 %v900_v16  ;;  %v920_v11 = vpack.c.bf16 %v352_v8, %v351_v6  ;;  %v354_v14 = vld [vmem:[%s1406_s6 + $0x58] sm:$0xff]  ;;  %v371_v15 = vld [vmem:[%s1406_s6 + $0xe0] sm:$0xff]  ;;  %v372_v16 = vld [vmem:[%s1406_s6 + $0xe8] sm:$0xff] }
  0x20   :  { %814 = vmatprep.subr.mxu1 %v991_v18  ;;  %v924_v17 = vpack.c.bf16 %v354_v14, %v353_v13  ;;  %v926_v19 = vpack.c.bf16 %v372_v16, %v371_v15  ;;  %v373_v22 = vld [vmem:[%s1406_s6 + $0xf0] sm:$0xff]  ;;  %v374_v23 = vld [vmem:[%s1406_s6 + $0xf8] sm:$0xff]  ;;  %v383_v30 = vld [vmem:[%s1408_s8 + $0x8] sm:$0xff] }
  0x21   :  { %882 = vmatpush3.bf16.msra.mxu0 %v881_v10  ;;  %v370_v10 = vld [vmem:[%s1406_s6 + $0xd8] sm:$0xff]  ;;  %v930_v25 = vpack.c.bf16 %v374_v23, %v373_v22  ;;  %v357_v26 = vld [vmem:[%s1406_s6 + $0x70] sm:$0xff] }
  0x22   :  { %934 = vmatprep.subr.bf16.mxu0 %v988_v7  ;;  %v922_v12 = vpack.c.bf16 %v370_v10, %v369_v9  ;;  %v358_v27 = vld [vmem:[%s1406_s6 + $0x78] sm:$0xff]  ;;  %v384_v33 = vld [vmem:[%s1408_s8 + $0x10] sm:$0xff] }
  0x23   :  { %815 = vmatpush3.msk.msra.mxu1 %vm269_vm5, %v84_v20  ;;  %v355_v20 = vld [vmem:[%s1406_s6 + $0x60] sm:$0xff]  ;;  %v932_v28 = vpack.c.bf16 %v358_v27, %v357_v26 }
  0x24   :  { %183 = vmatmul.mubr.f32.vlgmr.msra.gmra.mrb[0].mxu0 %v100_v44  ;;  %903 = vmatprep.subr.bf16.mxu1 %v902_v21  ;;  %v343_v44 = vld [vmem:[%s1406_s6] sm:$0xff]  ;;  %v356_v21 = vld [vmem:[%s1406_s6 + $0x68] sm:$0xff] }
  0x25   :  { %831 = vmatprep.mubr.msk.f32.mxu0 %vm990_vm0, %v991_v18  ;;  %936 = vmatpush3.bf16.msra.mxu0 %v935_v24  ;;  %v904_v32 = vpack.c.bf16 %v344_v45, %v343_v44  ;;  %v928_v24 = vpack.c.bf16 %v356_v21, %v355_v20  ;;  %v681_v45 = vld [vmem:[%s1407_s7] ss:$0 sm:$0xff] }
  0x26   :  { %937 = vmatprep.subr.bf16.mxu0 %v988_v7 }
  0x29   :  { %939 = vmatpush3.bf16.msra.mxu0 %v938_v29  ;;  %v382_v29 = vld [vmem:[%s1408_s8] sm:$0xff] }
  0x2a   :  { %940 = vmatprep.subr.bf16.mxu0 %v988_v7  ;;  %v945_v31 = vpack.c.bf16 %v383_v30, %v382_v29 }
  0x2d   :  { %943 = vmatpush3.bf16.msk.msra.mxu0 %vm1149_vm3, %v941_v34  ;;  %v385_v34 = vld [vmem:[%s1408_s8 + $0x18] sm:$0xff] }
  0x2e   :  { %944 = vmatprep.subr.bf16.mxu0 %v988_v7 }
  0x30   :  { %832 = vmatmul.mubr.msk.f32.vlgmr.msra.gmra.mrb[2].mxu0 %vm111_vm4, %v411_v35  ;;  %v948_v35 = vpack.c.bf16 %v385_v34, %v384_v33 }
  0x31   :  { %848 = vmatprep.mubr.msk.f32.mxu0 %vm990_vm0, %v991_v18  ;;  %946 = vmatpush3.bf16.msra.mxu0 %v945_v31 }
  0x32   :  { %947 = vmatprep.subr.bf16.mxu0 %v988_v7 }
  0x35   :  { %949 = vmatpush3.bf16.msra.mxu0 %v948_v35 }
  0x36   :  { %950 = vmatprep.subr.bf16.mxu0 %v988_v7 }
  0xe9   :  { %v254_v36 = vpop.f32.mrb[0].mxu1 }
  0xea   :  { %v801_v37 = vpop.f32.mrb[1].mxu1 }
  0xeb   :  { %v387_v37 = vld [vmem:[%s1408_s8 + $0x28] sm:$0xff] }
  0xf7   :  { %v719_v38 = vpop.f32.mrb[0].mxu0 }
  0xf8   :  { %v720_v39 = vpop.f32.mrb[1].mxu0 }
  0xf9   :  { %v721_v41 = vadd.f32 %v720_v39, %v719_v38 }
  0xfb   :  { %v185_v43 = vadd.f32 %v721_v41, %v675_v40  ;;  %v388_v41 = vld [vmem:[%s1408_s8 + $0x30] sm:$0x3] }
  0xfd   :  { %v255_v48 = vadd.f32 %v254_v36, %v185_v43  ;;  %v386_v36 = vld [vmem:[%s1408_s8 + $0x20] sm:$0xff] }
  0xfe   :  { %v951_v38 = vpack.c.bf16 %v387_v37, %v386_v36 }
  0xff   :  { %v258_v50 = vmax.f32 %v255_v48, 0.0 }
 0x100   :  { %952 = vmatpush3.bf16.msra.mxu0 %v951_v38 }
 0x101   :  { %817 = vmatmul.mubr.msk.f32.vlgmr.msra.gmra.mrb[2].mxu1 %vm265_vm6, %v258_v50  ;;  %846 = vmatprep.subr.mxu0 %v991_v18  ;;  %v684_v18 = vld [vmem:[%s1409_s9] ss:$0 sm:$0xff] }
 0x102   :  { %905 = vmatpush3.bf16.msra.mxu1 %v904_v32  ;;  %484 = vmatprep.mubr.f32.mxu1 %v412_v49  ;;  %v678_v49 = vld [vmem:[%s1405_s5] ss:$0 sm:$0xff]  ;;  %s993_s5 = smov [#allocation2]  }
 0x103   :  { %907 = vmatprep.subr.bf16.mxu1 %v906_v51  ;;  %v556_v39 = vpop.f32.mrb[2].mxu0  ;;  %s667_s7 = sshll.u32 %s993_s5, 4  ;;  %s668_s7 = int_to_ptr.vmem [resolvable:$true] %s667_s7 }
 0x104   :  { %v833_v40 = vpop.f32.mrb[3].mxu0  ;;  %847 = vmatpush3.msk.msra.mxu0 %vm269_vm5, %v388_v41  ;;  %s964_s9 = scalar_lea.vmem %s668_s7, 64  ;;  %p969_p1 = scmp.lt.s32.totalorder %s668_s7, %s668_s7 }
 0x105   :  { %p965_p0 = scmp.ne.s32.totalorder %s668_s7, %s964_s9  ;;  %p970_p2 = scmp.lt.s32.totalorder %s964_s9, %s964_s9 }
 0x106   :  { %909 = vmatpush3.bf16.msra.mxu1 %v908_v56 }
 0x107   :  { %911 = vmatprep.subr.bf16.mxu1 %v910_v57  ;;  %p971_p3 = por %p970_p2, %p969_p1 }
 0x109   :  { %p972_p4 = pnand %p971_p3, %p965_p0 }
 0x10a   :  { %913 = vmatpush3.bf16.msra.mxu1 %v912_v62 }
 0x10b   :  { %915 = vmatprep.subr.bf16.mxu1 %v914_v63 }
 0x10e   :  { %917 = vmatpush3.bf16.msra.mxu1 %v916_v4 }
 0x10f   :  { %919 = vmatprep.subr.bf16.mxu1 %v918_v5 }
 0x112   :  { %921 = vmatpush3.bf16.msra.mxu1 %v920_v11 }
 0x113   :  { %923 = vmatprep.subr.bf16.mxu1 %v922_v12 }
 0x116   :  { %925 = vmatpush3.bf16.msra.mxu1 %v924_v17 }
 0x117   :  { %927 = vmatprep.subr.bf16.mxu1 %v926_v19 }
 0x11a   :  { %929 = vmatpush3.bf16.msra.mxu1 %v928_v24 }
 0x11b   :  { %931 = vmatprep.subr.bf16.mxu1 %v930_v25 }
 0x11e   :  { %933 = vmatpush3.bf16.msra.mxu1 %v932_v28 }
 0x121   :  { %485 = vmatmul.mubr.f32.vlgmr.msra.gmra.mrb[4].mxu1 %v1253_v42 }
 0x1d4   :  { %v339_v7 = vpop.f32.mrb[2].mxu1 }
 0x1d5   :  { %v818_v42 = vpop.f32.mrb[3].mxu1  ;;  %v340_v53 = vadd.f32 %v678_v49, %v339_v7 }
 0x1f4   :  { %v769_v43 = vpop.f32.mrb[4].mxu1 }
 0x1f5   :  { %v770_v44 = vpop.f32.mrb[5].mxu1 }
 0x1f6   :  { %v771_v46 = vadd.f32 %v770_v44, %v769_v43 }
 0x1f8   :  { %v487_v47 = vadd.f32 %v771_v46, %v681_v45 }
 0x1fa   :  { %v557_v48 = vadd.f32 %v556_v39, %v487_v47 }
 0x1fc   :  { %v560_v32 = vmax.f32 %v557_v48, 0.0 }
 0x1fe   :  { %849 = vmatmul.mubr.msk.f32.vlgmr.msra.gmra.mrb[4].mxu0 %vm265_vm6, %v560_v32 }
 0x2d1   :  { %v639_v50 = vpop.f32.mrb[4].mxu0 }
 0x2d2   :  { %v640_v51 = vadd.f32 %v684_v18, %v639_v50  ;;  %v850_v52 = vpop.f32.mrb[5].mxu0 }
 0x2d4   :  { %v644_v54 = vrot.slane %v640_v51, 6 }
 0x2d6   :  { %v646_v55 = vsel %vm269_vm5, %v340_v53, %v644_v54 }
 0x2d7   :  { %v648_v56 = vsel %vm647_vm7, %v646_v55, -inf }
 0x2d8   :  { %649 = vmax.xlane.f32.xlu0 %v648_v56 }
 0x365   :  { %v650_v57 = vpop.xlane.xlu0 %649 }
 0x366   :  { %v651_v58 = vsub.f32 %v646_v55, %v650_v57 }
 0x368   :  { %v652_v59 = vmul.f32 1.442695, %v651_v58 }
 0x36a   :  { %960 = vpow2.f32 %v652_v59 }
 0x374   :  { %v961_v60 = vpop.eup %960 }
 0x375   :  { %v654_v61 = vsel %vm647_vm7, %v961_v60, 0.0 }
 0x376   :  { %655 = vadd.xlane.f32.xlu0 %v654_v61 }
 0x403   :  { %v656_v62 = vpop.xlane.xlu0 %655 }
 0x404   :  { %962 = vlog2.f32 %v656_v62 }
 0x40e   :  { %v963_v63 = vpop.eup %962 }
 0x40f   :  { %v658_v0 = vmul.f32 0.6931472, %v963_v63 }
 0x411   :  { %v659_v1 = vsub.f32 %v651_v58, %v658_v0 }
 0x413   :  { %660 = vst.msk [vmem:[#allocation2] sm:$0xf] %vm647_vm7, %v659_v1 }
 0x414   :  { %975 = shalt.err (!%p972_p4)
}
 0x415   :  { %s976_s23 = scalar_lea.hbm %s1410_s10, 64 }
 0x416   :  { %p977_p5 = scmp.ne.s32.totalorder %s1410_s10, %s976_s23  ;;  %p980_p6 = scmp.lt.u32.totalorder %s976_s23, %s1410_s10 }
 0x418   :  { %p982_p7 = pnand %p980_p6, %p977_p5 }
 0x41a   :  { %985 = shalt.err (!%p982_p7)
}
 0x41b   :  { %670 = dma.vmem_to_hbm [thread:$0]  %s668_s7, 64, %s1410_s10, [#allocation3]  }
 0x41c   :  { %986 = dma.done.wait [#allocation3], 64  }
 0x41d   :  { %987 = vsyncadd [#allocation3], 4294967232 }
 0x41e   :  { %674 = vsyncpa [#allocation3], 1 }

</bundles_post_ra>
